<compile_context>
chip_gen: v5e
topology: v5e:2x2
jax: 0.10.0
libtpu: 0.0.40
codegen_flags: <defaults>
</compile_context>

<pallas_src>
import jax
import jax.numpy as jnp
from jax.experimental import pallas as pl
from jax.experimental.pallas import tpu as pltpu

LRELU_SLOPE = 0.01   # nn.LeakyReLU() default
BN_EPS = 1e-5        # nn.BatchNorm2d default


def _conv_stats_kernel(p_ref, w_ref, conv_ref, stats_ref):
    """Pass 1: one deep bf16 matmul per M-tile + per-tile partial BatchNorm statistics."""
    # (tile_m, K) @ (K, Cout_pad): bf16 operands, f32 accumulation on the MXU.
    acc = jnp.dot(p_ref[...], w_ref[...], preferred_element_type=jnp.float32)
    # Partial stats from the f32 accumulator BEFORE the bf16 downcast.  Padded M rows are
    # all-zero patches -> contribute 0 to both sums, so dividing by the TRUE row count in
    # the wrapper gives exact batch statistics.
    # TODO(synk): switch to centered (Welford-style) partials if E[x^2]-mean^2 ever shows
    # cancellation at extreme conv magnitudes.
    s = jnp.sum(acc, axis=0, keepdims=True)             # (1, Cout_pad)
    ss = jnp.sum(acc * acc, axis=0, keepdims=True)      # (1, Cout_pad)
    stats_ref[0] = jnp.concatenate([s, ss], axis=0)     # (2, Cout_pad)
    conv_ref[...] = acc.astype(conv_ref.dtype)          # bf16 intermediate -> half the HBM


def _bn_lrelu_kernel(conv_ref, scale_ref, shift_ref, o_ref):
    """Pass 2: y = conv * scale + shift, then LeakyReLU.  f32 math, lane-dense stores."""
    y = conv_ref[...].astype(jnp.float32) * scale_ref[...] + shift_ref[...]
    o_ref[...] = jnp.where(y > 0, y, LRELU_SLOPE * y).astype(o_ref.dtype)


def conv2d_block(x_nchw, w_oihw, bias, gamma, beta, *, ks=3, stride=1, pd=1,
                 tile_m=512, out_dtype=jnp.float32):
    """Forward of Conv2D(indim, outdim, ks=3, stride=1, pd=1, norm='batch', act='lrelu')."""
    # Per-channel conv bias before training-mode BatchNorm is exactly cancelled by the
    # mean subtraction -> drop it (zero numerical effect on the module output).
    del bias
    assert stride == 1  # TODO(synk): general stride would need a strided im2col
    N, Cin, H, W = x_nchw.shape
    Cout = w_oihw.shape[0]
    Ho = (H + 2 * pd - ks) // stride + 1
    Wo = (W + 2 * pd - ks) // stride + 1
    M = N * Ho * Wo
    K = ks * ks * Cin
    Cout_pad = ((Cout + 127) // 128) * 128
    out_bytes = jnp.finfo(out_dtype).bits // 8

    # ---- tile_m selection ---------------------------------------------------------------
    # Sublane-aligned tile (bf16 packs 16 rows per vreg).
    tile_m = max(16, (min(tile_m, max(M, 16)) // 16) * 16)

    def _vmem_footprint(tm):
        pass1 = (2 * tm * K * 2              # patches, double-buffered bf16
                 + 1 * K * Cout_pad * 2      # weights, single-buffered bf16
                 + 2 * tm * Cout_pad * 2     # conv out, double-buffered bf16
                 + 2 * 2 * Cout_pad * 4)     # stats out, double-buffered f32
        pass2 = (2 * tm * Cout_pad * 2       # conv in, double-buffered bf16
                 + 2 * Cout_pad * 4          # scale + shift, single-buffered f32
                 + 2 * tm * Cout_pad * out_bytes)
        return max(pass1, pass2)

    # Shrink tile_m until the double-buffered pipeline fits a 40 MB budget (leaves headroom
    # inside v7x's 64 MiB per-TC VMEM; v5e/v6e have 128 MiB).
    # TODO(synk): at very large K (= 9*Cin), tile K with an 'arbitrary' grid axis and an
    # f32 VMEM accumulator instead of shrinking tile_m further.
    VMEM_BUDGET = 40 << 20
    while tile_m > 16 and _vmem_footprint(tile_m) > VMEM_BUDGET:
        tile_m = max(16, (tile_m // 32) * 16)

    # Keep >= 2 (and preferably an even number of) M tiles so the 'parallel' axis
    # load-balances across v7x's two TensorCores.
    num_tiles = pl.cdiv(M, tile_m)
    if M >= 32 and num_tiles == 1:
        tile_m = max(16, (((M + 1) // 2 + 15) // 16) * 16)
        num_tiles = pl.cdiv(M, tile_m)
    if num_tiles > 1 and num_tiles % 2 == 1:
        cand = max(16, ((pl.cdiv(M, num_tiles + 1) + 15) // 16) * 16)
        if pl.cdiv(M, cand) % 2 == 0:
            tile_m = cand
            num_tiles = pl.cdiv(M, cand)
    M_pad = num_tiles * tile_m

    # Raise the scoped VMEM limit to the actual footprint + headroom (v5e default scoped
    # limit is 16 MiB, v6e/v7x 32 MiB), capped at v7x's 64 MiB physical per TensorCore.
    vmem_limit = int(min(max(_vmem_footprint(tile_m) + (16 << 20), 24 << 20), 64 << 20))
    cparams = pltpu.CompilerParams(dimension_semantics=("parallel",),
                                   vmem_limit_bytes=vmem_limit)

    # ---- glue (plain JAX): NCHW->NHWC, bf16 FIRST, zero pad, im2col ONCE ------------------
    # Casting to bf16 before the 9x expansion halves the patch-slab HBM traffic.
    # TODO(synk): keeping activations NHWC (and bf16) across layers would remove the
    # transposes on both ends of this block.
    x = jnp.transpose(x_nchw, (0, 2, 3, 1)).astype(jnp.bfloat16)
    xp = jnp.pad(x, ((0, 0), (pd, pd), (pd, pd), (0, 0)))
    taps = [xp[:, kh:kh + Ho, kw:kw + Wo, :] for kh in range(ks) for kw in range(ks)]
    patches = jnp.concatenate(taps, axis=-1).reshape(M, K)   # feature order = (kh, kw, cin)
    patches = jnp.pad(patches, ((0, M_pad - M), (0, 0)))     # zero rows -> zero stat impact

    # OIHW -> (kh, kw, cin) x Cout, pad Cout to a lane-dense multiple of 128.
    w2d = jnp.transpose(w_oihw, (2, 3, 1, 0)).reshape(K, Cout)
    w2d = jnp.pad(w2d, ((0, 0), (0, Cout_pad - Cout))).astype(jnp.bfloat16)

    # ---- pass 1: conv + per-tile partial stats (M axis fully parallel) --------------------
    conv, stats = pl.pallas_call(
        _conv_stats_kernel,
        out_shape=(jax.ShapeDtypeStruct((M_pad, Cout_pad), jnp.bfloat16),
                   jax.ShapeDtypeStruct((num_tiles, 2, Cout_pad), jnp.float32)),
        grid_spec=pltpu.PrefetchScalarGridSpec(
            num_scalar_prefetch=0,
            grid=(num_tiles,),
            in_specs=(pl.BlockSpec((tile_m, K), lambda m: (m, 0)),
                      # Constant across the grid -> single-buffered, VMEM-resident weights.
                      pl.BlockSpec((K, Cout_pad), lambda m: (0, 0),
                                   pipeline_mode=pl.Buffered(1))),
            out_specs=(pl.BlockSpec((tile_m, Cout_pad), lambda m: (m, 0)),
                       pl.BlockSpec((1, 2, Cout_pad), lambda m: (m, 0, 0)))),
        compiler_params=cparams,
    )(patches, w2d)

    # ---- tiny per-channel stats reduction + affine folding (2*Cout_pad floats) ------------
    total = jnp.sum(stats[:, 0, :], axis=0)
    total_sq = jnp.sum(stats[:, 1, :], axis=0)
    mean = total / M                                  # divide by TRUE row count (not M_pad)
    var = total_sq / M - mean * mean                  # biased batch variance
    inv_std = jax.lax.rsqrt(var + BN_EPS)
    # Padded Cout channels get inv_std = 1/sqrt(eps); harmless because gamma is ZERO-padded.
    gamma_p = jnp.pad(gamma.astype(jnp.float32), (0, Cout_pad - Cout))
    beta_p = jnp.pad(beta.astype(jnp.float32), (0, Cout_pad - Cout))
    scale = (gamma_p * inv_std).reshape(1, Cout_pad)
    shift = (beta_p - mean * gamma_p * inv_std).reshape(1, Cout_pad)

    # ---- pass 2: normalize + LeakyReLU (M axis fully parallel, lane-dense output) ---------
    out = pl.pallas_call(
        _bn_lrelu_kernel,
        out_shape=jax.ShapeDtypeStruct((M_pad, Cout_pad), out_dtype),
        grid_spec=pltpu.PrefetchScalarGridSpec(
            num_scalar_prefetch=0,
            grid=(num_tiles,),
            in_specs=(pl.BlockSpec((tile_m, Cout_pad), lambda m: (m, 0)),
                      pl.BlockSpec((1, Cout_pad), lambda m: (0, 0),
                                   pipeline_mode=pl.Buffered(1)),
                      pl.BlockSpec((1, Cout_pad), lambda m: (0, 0),
                                   pipeline_mode=pl.Buffered(1))),
            out_specs=pl.BlockSpec((tile_m, Cout_pad), lambda m: (m, 0))),
        compiler_params=cparams,
    )(conv, scale, shift)

    # (M_pad, Cout_pad) -> strip padding -> NCHW to match the PyTorch module output.
    # TODO(synk): chained layers should keep the NHWC (M, Cout) slab and skip this transpose.
    out = out[:M, :Cout].reshape(N, Ho, Wo, Cout)
    return jnp.transpose(out, (0, 3, 1, 2))


def reference(x_nchw, w_oihw, bias, gamma, beta, *, pd=1):
    """Pure-JAX reference matching torch semantics (training-mode BatchNorm), exact f32 conv."""
    y = jax.lax.conv_general_dilated(
        x_nchw.astype(jnp.float32), w_oihw.astype(jnp.float32),
        window_strides=(1, 1), padding=((pd, pd), (pd, pd)),
        dimension_numbers=("NCHW", "OIHW", "NCHW"),
        precision=jax.lax.Precision.HIGHEST)
    y = y + bias[None, :, None, None]
    mean = jnp.mean(y, axis=(0, 2, 3), keepdims=True)
    var = jnp.mean((y - mean) ** 2, axis=(0, 2, 3), keepdims=True)
    y = (y - mean) * jax.lax.rsqrt(var + BN_EPS)
    y = y * gamma[None, :, None, None] + beta[None, :, None, None]
    return jnp.where(y > 0, y, LRELU_SLOPE * y)


if __name__ == "__main__":
    # Small shapes consistent with the module: indim=4, outdim=8, 16x16 spatial, batch=2.
    N, Cin, H, W = 2, 4, 16, 16
    Cout, ks, pd = 8, 3, 1

    key = jax.random.PRNGKey(0)
    kx, kw, kb = jax.random.split(key, 3)

    x = jax.random.normal(kx, (N, Cin, H, W), dtype=jnp.float32)
    fan_in = Cin * ks * ks
    bound = 1.0 / jnp.sqrt(fan_in)
    w = jax.random.uniform(kw, (Cout, Cin, ks, ks), jnp.float32, -bound, bound)
    b = jax.random.uniform(kb, (Cout,), jnp.float32, -bound, bound)
    gamma = jnp.ones((Cout,), jnp.float32)   # BatchNorm2d default weight
    beta = jnp.zeros((Cout,), jnp.float32)   # BatchNorm2d default bias

    # M = 512 -> 4 tiles of 128 (exercises the grid / pipelining path).
    out = jax.block_until_ready(conv2d_block(x, w, b, gamma, beta, ks=ks, pd=pd, tile_m=128))
    assert out.shape == (N, Cout, H, W), out.shape
    assert bool(jnp.all(jnp.isfinite(out)))

    # Check against a reference fed the same bf16-quantized conv operands the kernel gives
    # the MXU; the remaining delta is the bf16 conv intermediate between the two passes.
    xq = x.astype(jnp.bfloat16).astype(jnp.float32)
    wq = w.astype(jnp.bfloat16).astype(jnp.float32)
    ref_q = jax.block_until_ready(reference(xq, wq, b, gamma, beta, pd=pd))
    assert jnp.allclose(out, ref_q, atol=2e-2, rtol=2e-2), float(jnp.max(jnp.abs(out - ref_q)))

    # Looser semantic check against the exact f32 reference (bf16 MXU operands + bf16
    # intermediate slab).
    ref = jax.block_until_ready(reference(x, w, b, gamma, beta, pd=pd))
    assert jnp.allclose(out, ref, atol=5e-2, rtol=5e-2), float(jnp.max(jnp.abs(out - ref)))

    # Exercise the M-padding path: 512 rows with tile_m=96 -> 6 tiles, 64 padded rows whose
    # zero contribution must not perturb the batch statistics.
    out2 = jax.block_until_ready(conv2d_block(x, w, b, gamma, beta, ks=ks, pd=pd, tile_m=96))
    assert jnp.allclose(out2, ref_q, atol=2e-2, rtol=2e-2), float(jnp.max(jnp.abs(out2 - ref_q)))

    # Exercise the bf16-output path (what a chained layer would consume) and the automatic
    # tile_m split (requested 512-row tile -> 2 tiles for v7x megacore balance).
    out3 = jax.block_until_ready(
        conv2d_block(x, w, b, gamma, beta, ks=ks, pd=pd, tile_m=512, out_dtype=jnp.bfloat16))
    assert out3.dtype == jnp.bfloat16
    assert bool(jnp.all(jnp.isfinite(out3.astype(jnp.float32))))
    assert jnp.allclose(out3.astype(jnp.float32), ref_q, atol=6e-2, rtol=6e-2)

    print("KERNEL_OK")
</pallas_src>

<mosaic_0001>
module attributes {stable_mosaic.version = 11 : i64} {
  func.func @_conv_stats_kernel(%arg0: i32, %arg1: memref<128x36xbf16, #tpu.memory_space<vmem>>, %arg2: memref<36x128xbf16, #tpu.memory_space<vmem>>, %arg3: memref<128x128xbf16, #tpu.memory_space<vmem>>, %arg4: memref<1x2x128xf32, #tpu.memory_space<vmem>>) attributes {dimension_semantics = [#tpu.dimension_semantics<parallel>], iteration_bounds = array<i64: 4>, scalar_prefetch = 0 : i64, scratch_operands = 0 : i64, tpu.core_type = #tpu.core_type<tc>, window_params = [{transform_indices = @transform_0, window_bounds = array<i64: 128, 36>}, {pipeline_mode = #tpu.pipeline_mode<synchronous>, transform_indices = @transform_1, window_bounds = array<i64: 36, 128>}, {transform_indices = @transform_2, window_bounds = array<i64: 128, 128>}, {transform_indices = @transform_3, window_bounds = array<i64: 1, 2, 128>}]} {
    %c0 = arith.constant 0 : index
    %c0_0 = arith.constant 0 : index
    %0 = vector.load %arg1[%c0, %c0_0] : memref<128x36xbf16, #tpu.memory_space<vmem>>, vector<128x36xbf16>
    %c0_1 = arith.constant 0 : index
    %c0_2 = arith.constant 0 : index
    %1 = vector.load %arg2[%c0_1, %c0_2] : memref<36x128xbf16, #tpu.memory_space<vmem>>, vector<36x128xbf16>
    %cst = arith.constant dense<0.000000e+00> : vector<128x128xf32>
    %2 = tpu.matmul %0, %1, %cst {dimension_numbers = #tpu.dot_dimension_numbers<[1], [0], [0], [1], [0, 0, 1, 1], [], []>} : vector<128x36xbf16>, vector<36x128xbf16>, vector<128x128xf32> -> vector<128x128xf32>
    %cst_3 = arith.constant dense<0.000000e+00> : vector<128xf32>
    %3 = vector.multi_reduction <add>, %2, %cst_3 [0] : vector<128x128xf32> to vector<128xf32>
    %4 = vector.shape_cast %3 : vector<128xf32> to vector<1x128xf32>
    %5 = arith.mulf %2, %2 : vector<128x128xf32>
    %cst_4 = arith.constant dense<0.000000e+00> : vector<128xf32>
    %6 = vector.multi_reduction <add>, %5, %cst_4 [0] : vector<128x128xf32> to vector<128xf32>
    %7 = vector.shape_cast %6 : vector<128xf32> to vector<1x128xf32>
    %8 = tpu.concatenate %4, %7 in 0 : vector<1x128xf32>, vector<1x128xf32> -> vector<2x128xf32>
    %c0_5 = arith.constant 0 : index
    %c0_6 = arith.constant 0 : index
    %c0_7 = arith.constant 0 : index
    %9 = vector.load %arg4[%c0_5, %c0_6, %c0_7] : memref<1x2x128xf32, #tpu.memory_space<vmem>>, vector<1x2x128xf32>
    %10 = vector.shape_cast %9 : vector<1x2x128xf32> to vector<2x128xf32>
    %11 = vector.shape_cast %8 : vector<2x128xf32> to vector<1x2x128xf32>
    tpu.vector_store %arg4[%c0_5, %c0_6, %c0_7], %11 {strides = array<i32>} : memref<1x2x128xf32, #tpu.memory_space<vmem>>, vector<1x2x128xf32>,
    %12 = arith.truncf %2 : vector<128x128xf32> to vector<128x128xbf16>
    %c0_8 = arith.constant 0 : index
    %c0_9 = arith.constant 0 : index
    %13 = vector.load %arg3[%c0_8, %c0_9] : memref<128x128xbf16, #tpu.memory_space<vmem>>, vector<128x128xbf16>
    tpu.vector_store %arg3[%c0_8, %c0_9], %12 {strides = array<i32>} : memref<128x128xbf16, #tpu.memory_space<vmem>>, vector<128x128xbf16>,
    return
  }
  func.func @transform_0(%arg0: i32) -> (i32, i32) {
    %c0_i32 = arith.constant 0 : i32
    %c0_i32_0 = arith.constant 0 : i32
    return %arg0, %c0_i32 : i32, i32
  }
  func.func @transform_1(%arg0: i32) -> (i32, i32) {
    %c0_i32 = arith.constant 0 : i32
    %c0_i32_0 = arith.constant 0 : i32
    %c0_i32_1 = arith.constant 0 : i32
    return %c0_i32, %c0_i32_0 : i32, i32
  }
  func.func @transform_2(%arg0: i32) -> (i32, i32) {
    %c0_i32 = arith.constant 0 : i32
    %c0_i32_0 = arith.constant 0 : i32
    return %arg0, %c0_i32 : i32, i32
  }
  func.func @transform_3(%arg0: i32) -> (i32, i32, i32) {
    %c0_i32 = arith.constant 0 : i32
    %c0_i32_0 = arith.constant 0 : i32
    %c0_i32_1 = arith.constant 0 : i32
    return %arg0, %c0_i32, %c0_i32_0 : i32, i32, i32
  }
}

</mosaic_0001>

<bundles_post_ra>
// kernel: tpu_custom_call.1
= control target key start
LH: loop header
LB: loop body
LE: loop exit
PB: predicated region body
PF: predicated region fallthrough
CT: control target
= control target key end

     0   :  { %9 = vsyncpa [#allocation3], 0  ;;  %s1014_s0 = inlined_call_operand.vmem [shape: bf16[512,36], index: 0, kind: input, shape index: {}]   ;;  %s1015_s1 = inlined_call_operand.vmem [shape: bf16[36,128], index: 1, kind: input, shape index: {}]   ;;  %s1016_s2 = inlined_call_operand.hbm [shape: bf16[512,128], index: 2, kind: output, shape index: {0}]   ;;  %s1017_s3 = inlined_call_operand.hbm [shape: f32[4,2,128], index: 3, kind: output, shape index: {1}]  }
   0x1   :  { %11 = vsyncpa [#allocation3 + $0x1], 0 }
   0x2   :  { %12 = vsyncpa [#allocation5], 0 }
   0x3   :  { %14 = vsyncpa [#allocation5 + $0x1], 0  ;;  %s855_s12 = smov 0   ;;  %s857_s13 = smov 0  }
   0x4   :  { %s859_s14 = smov 0   ;;  %s861_s15 = smov 0  }
   0x5 LB: > { %s876_s16 = sadd.s32 4294967295, %s831_s15   ;;  %s561_s17 = sadd.s32 4294967294, %s831_s15   ;;  %s831_s15 = sphi %s861_s15, %s1023_s15   ;;  %s827_s14 = sphi %s859_s14, %s1022_s14   ;;  %s823_s13 = sphi %s857_s13, %s1021_s13   ;;  %s819_s12 = sphi %s855_s12, %s1020_s12  }
   0x6   : > { %s880_s18 = sadd.s32 1, %s831_s15   ;;  %s74_s19 = sadd.s32 1, %s827_s14 }
   0x7   : > { %s71_s20 = ssub.s32 %s831_s15, %s880_s18  ;;  %p84_p0 = scmp.ne.s32.totalorder %s827_s14, %s823_s13 }
   0x8   : > { %p72_p1 = scmp.eq.s32.totalorder %s71_s20, 0  ;;  %p85_p2 = scmp.eq.s32.totalorder %s876_s16, 3 }
   0x9   : > { %p90_p3 = scmp.ne.s32.totalorder %s823_s13, %s819_s12  ;;  %p91_p4 = scmp.eq.s32.totalorder %s561_s17, 3 }
   0xa   : > { %s891_s21 = scalar_select %p72_p1, %s827_s14, %s74_s19  }
   0xb   : > { %p893_p5 = por %p85_p2, %p84_p0  ;;  %p897_p6 = por %p91_p4, %p90_p3 }
   0xc   : > { %p564_p7 = scmp.ge.s32.totalorder %s831_s15, 1  ;;  %p147_p8 = scmp.lt.s32.totalorder %s831_s15, 5 }
   0xe   : > { %p148_p9 = pnand %p564_p7, %p147_p8 }
   0xf   : > { %s567_s26 = sshll.u32 (!%p148_p9), %s876_s16, 4  ;;  %s925_s8 = sand.u32 (!%p148_p9), 1, %s823_s13  }
  0x10   : > { %151 = sbr.rel (%p148_p9) target bundleno = 232 (0xe8), region = 28  ;;  %p177_p10 = scmp.lt.s32.totalorder (!%p148_p9), %s567_s26, 63 }
  0x11   : > { %s565_s9 = sshll.u32 (!%p148_p9), %s925_s8, 6  ;;  %s634_s11 = sshll.u32 (!%p148_p9), %s876_s16, 6 }
  0x12   : > { %s930_s10 = scalar_lea.vmem (!%p148_p9), [#allocation2], %s565_s9  ;;  %s448_s20 = scalar_lea.hbm (!%p148_p9), %s1016_s2, %s634_s11 }
  0x13   : > { %s449_s24 = sshll.u32 (!%p148_p9), %s930_s10, 4  ;;  %s451_s25 = sshll.u32 (!%p148_p9), %s448_s20, 4  ;;  %s953_s24 = int_to_ptr.vmem [resolvable:$true] %s449_s24  ;;  %s452_s25 = int_to_ptr.hbm [resolvable:$true] %s451_s25 }
  0x14   : > { %s751_s27 = sshra.s32 (!%p148_p9), %s452_s25, 4  ;;  %s757_s4 = scalar_lea.hbm (!%p148_p9), %s1016_s2, 256  ;;  %s752_s27 = int_to_ptr.hbm [resolvable:$true] %s751_s27 }
  0x15   : > { %v204_v0 = vld [vmem:[%s1015_s1 + $0x10] sm:$0x3]  ;;  %vm285_vm0 = vcmask 1041408   ;;  %s1025_s26 = smov (!%p177_p10, %s567_s26), 63  ;;  %v633_v4 = vld [vmem:[%s1015_s1 + $0x8] sm:$0xff]  ;;  %v632_v5 = vld [vmem:[%s1015_s1] sm:$0xff]  ;;  %p758_p0 = scmp.lt.s32.totalorder %s752_s27, %s1016_s2 }
  0x16   : > { %v254_v1 = vunpack.c.l.b16 %v204_v0  ;;  %s568_s29 = sshll.u32 %s1025_s26, 2  ;;  %vm260_vm1 = vcmask 293888   ;;  %s432_s26 = scalar_lea.sflag [#allocation3], %s925_s8 }
  0x17   : > { %s180_s7 = scalar_lea.vmem %s1014_s0, %s568_s29  ;;  %s753_s28 = scalar_lea.hbm %s752_s27, 64 }
  0x18   : > { %v257_v2 = vpack.c.b16 %v254_v1, %v254_v1  ;;  %v624_v6 = vld [vmem:[%s180_s7] sm:$0xff]  ;;  %v626_v7 = vld [vmem:[%s180_s7 + $0x10] sm:$0xff]  ;;  %v625_v10 = vld [vmem:[%s180_s7 + $0x8] sm:$0xff]  ;;  %p754_p11 = scmp.ne.s32.totalorder %s752_s27, %s753_s28  ;;  %p759_p1 = scmp.lt.s32.totalorder %s757_s4, %s753_s28 }
  0x19   : > { %v628_v8 = vld [vmem:[%s180_s7 + $0x20] sm:$0xff]  ;;  %v630_v9 = vld [vmem:[%s180_s7 + $0x30] sm:$0xff]  ;;  %v627_v11 = vld [vmem:[%s180_s7 + $0x18] sm:$0xff] }
  0x1a   : > { %v287_v3 = vsel %vm285_vm0, %v257_v2, 0  ;;  %v629_v12 = vld [vmem:[%s180_s7 + $0x28] sm:$0xff]  ;;  %v631_v13 = vld [vmem:[%s180_s7 + $0x38] sm:$0xff]  ;;  %p755_p12 = pnand %p754_p11, %p893_p5  ;;  %p760_p2 = por %p759_p1, %p758_p0 }
  0x1b   : > { %294 = vmatpush.bf16.msra.mxu0 %v287_v3  ;;  %682 = vmatpush.bf16.msra.mxu1 %v287_v3 }
  0x1c   : > { %683 = vmatpush.bf16.msra.mxu2 %v287_v3  ;;  %684 = vmatpush.bf16.msra.mxu3 %v287_v3  ;;  %p756_p13 = pneg %p755_p12 }
  0x1e   : > { %p761_p3 = pnand %p760_p2, %p756_p13 }
  0x1f   : > { %295 = vmatpush.bf16.msra.mxu0 %v633_v4  ;;  %685 = vmatpush.bf16.msra.mxu1 %v633_v4 }
  0x20   : > { %686 = vmatpush.bf16.msra.mxu2 %v633_v4  ;;  %687 = vmatpush.bf16.msra.mxu3 %v633_v4 }
  0x23   : > { %296 = vmatpush.bf16.msra.mxu0 %v632_v5  ;;  %688 = vmatpush.bf16.msra.mxu1 %v632_v5 }
  0x24   : > { %689 = vmatpush.bf16.msra.mxu2 %v632_v5  ;;  %690 = vmatpush.bf16.msra.mxu3 %v632_v5 }
  0x26   : > { %609 = vmatmul.msk.bf16.vlgmr.msra.gmra.mxu0 %vm260_vm1, %v624_v6  ;;  %611 = vmatmul.msk.bf16.vlgmr.msra.gmra.mxu1 %vm260_vm1, %v626_v7 }
  0x27   : > { %613 = vmatmul.msk.bf16.vlgmr.msra.gmra.mxu2 %vm260_vm1, %v628_v8  ;;  %615 = vmatmul.msk.bf16.vlgmr.msra.gmra.mxu3 %vm260_vm1, %v630_v9 }
  0x36   : > { %610 = vmatmul.msk.bf16.gmra.mxu0 %vm260_vm1, %v625_v10  ;;  %612 = vmatmul.msk.bf16.gmra.mxu1 %vm260_vm1, %v627_v11 }
  0x37   : > { %614 = vmatmul.msk.bf16.gmra.mxu2 %vm260_vm1, %v629_v12  ;;  %616 = vmatmul.msk.bf16.gmra.mxu3 %vm260_vm1, %v631_v13 }
  0xa3   : > { %v298_v14 = vpop.f32.mrf.mxu0  ;;  %v308_v15 = vpop.f32.mrf.mxu1 }
  0xa4   : > { %v359_v29 = vmul.f32 %v298_v14, %v298_v14  ;;  %v363_v43 = vmul.f32 %v308_v15, %v308_v15 }
  0xaa   : > { %v318_v16 = vpop.f32.mrf.mxu2  ;;  %v928_v17 = vpop.f32.mrf.mxu3 }
  0xab   : > { %v300_v18 = vpop.f32.mrf.mxu0  ;;  %v310_v19 = vpop.f32.mrf.mxu1  ;;  %v367_v59 = vmul.f32 %v318_v16, %v318_v16 }
  0xac   : > { %v638_v20 = vpack.c.bf16 %v300_v18, %v298_v14  ;;  %v648_v21 = vpack.c.bf16 %v310_v19, %v308_v15  ;;  %v360_v28 = vmul.f32 %v300_v18, %v300_v18  ;;  %v338_v30 = vadd.f32 %v300_v18, %v298_v14 }
  0xad   : > { %v364_v46 = vmul.f32 %v310_v19, %v310_v19 }
  0xae   : > { %639 = vst [vmem:[%s930_s10] sm:$0xff] %v638_v20   ;;  %v375_v32 = vadd.f32 %v360_v28, %v359_v29 }
  0xaf   : > { %676 = vst [vmem:[%s930_s10 + $0x10] sm:$0xff] %v648_v21  }
  0xb2   : > { %v934_v22 = vpop.f32.mrf.mxu2  ;;  %v936_v23 = vpop.f32.mrf.mxu3 }
  0xb3   : > { %v303_v24 = vpop.f32.mrf.mxu0  ;;  %v313_v25 = vpop.f32.mrf.mxu1  ;;  %v658_v26 = vpack.c.bf16 %v934_v22, %v318_v16  ;;  %v668_v27 = vpack.c.bf16 %v936_v23, %v928_v17 }
  0xb4   : > { %v361_v31 = vmul.f32 %v303_v24, %v303_v24  ;;  %v339_v33 = vadd.f32 %v338_v30, %v303_v24  ;;  %v365_v49 = vmul.f32 %v313_v25, %v313_v25 }
  0xb5   : > { %678 = vst [vmem:[%s930_s10 + $0x20] sm:$0xff] %v658_v26  }
  0xb6   : > { %680 = vst [vmem:[%s930_s10 + $0x30] sm:$0xff] %v668_v27   ;;  %v376_v38 = vadd.f32 %v375_v32, %v361_v31 }
  0xba   : > { %v323_v34 = vpop.f32.mrf.mxu2  ;;  %v943_v35 = vpop.f32.mrf.mxu3 }
  0xbb   : > { %v305_v36 = vpop.f32.mrf.mxu0  ;;  %v315_v37 = vpop.f32.mrf.mxu1 }
  0xbc   : > { %v340_v39 = vadd.f32 %v339_v33, %v305_v36  ;;  %v362_v40 = vmul.f32 %v305_v36, %v305_v36  ;;  %v643_v41 = vpack.c.bf16 %v305_v36, %v303_v24  ;;  %v653_v42 = vpack.c.bf16 %v315_v37, %v313_v25 }
  0xbd   : > { %v366_v57 = vmul.f32 %v315_v37, %v315_v37 }
  0xbe   : > { %v341_v44 = vadd.f32 %v340_v39, %v308_v15  ;;  %v377_v45 = vadd.f32 %v376_v38, %v362_v40  ;;  %675 = vst [vmem:[%s930_s10 + $0x8] sm:$0xff] %v643_v41  }
  0xbf   : > { %677 = vst [vmem:[%s930_s10 + $0x18] sm:$0xff] %v653_v42  }
  0xc0   : > { %v378_v47 = vadd.f32 %v377_v45, %v363_v43  ;;  %v342_v48 = vadd.f32 %v341_v44, %v310_v19 }
  0xc2   : > { %v343_v50 = vadd.f32 %v342_v48, %v313_v25  ;;  %v379_v51 = vadd.f32 %v378_v47, %v364_v46  ;;  %v325_v52 = vpop.f32.mrf.mxu2  ;;  %v335_v53 = vpop.f32.mrf.mxu3 }
  0xc3   : > { %v663_v54 = vpack.c.bf16 %v325_v52, %v323_v34  ;;  %v673_v55 = vpack.c.bf16 %v335_v53, %v943_v35 }
  0xc4   : > { %v344_v56 = vadd.f32 %v343_v50, %v315_v37  ;;  %v380_v58 = vadd.f32 %v379_v51, %v365_v49 }
  0xc5   : > { %679 = vst [vmem:[%s930_s10 + $0x28] sm:$0xff] %v663_v54  }
  0xc6   : > { %v345_v60 = vadd.f32 %v344_v56, %v318_v16  ;;  %v381_v61 = vadd.f32 %v380_v58, %v366_v57  ;;  %681 = vst [vmem:[%s930_s10 + $0x38] sm:$0xff] %v673_v55  }
  0xc7   : > { %764 = shalt.err (!%p761_p3)
}
  0xc8   : > { %s833_s7 = smov 64   ;;  %s834_s9 = smov 4   ;;  %v368_v62 = vmul.f32 %v934_v22, %v934_v22  ;;  %v382_v63 = vadd.f32 %v381_v61, %v367_v59  ;;  %v346_v0 = vadd.f32 %v345_v60, %v934_v22  ;;  %v369_v2 = vmul.f32 %v323_v34, %v323_v34 }
  0xc9   : > { %691 = dma.vmem_to_hbm [thread:$0]  (%p893_p5), %s953_s24, 1024, %s452_s25, %s432_s26, %s833_s7, %s833_s7, %s834_s9   ;;  %v370_v6 = vmul.f32 %v325_v52, %v325_v52  ;;  %v371_v7 = vmul.f32 %v928_v17, %v928_v17  ;;  %v372_v10 = vmul.f32 %v936_v23, %v936_v23  ;;  %v373_v14 = vmul.f32 %v943_v35, %v943_v35 }
  0xca   : > { %v347_v1 = vadd.f32 %v346_v0, %v323_v34  ;;  %v383_v3 = vadd.f32 %v382_v63, %v368_v62  ;;  %v374_v19 = vmul.f32 %v335_v53, %v335_v53  ;;  %s566_s10 = sshll.u32 %s925_s8, 1  ;;  %s621_s11 = sshll.u32 %s876_s16, 1  ;;  %vm396_vm2 = vcmask 1040384  }
  0xcb   : > { %s464_s20 = scalar_lea.hbm %s1017_s3, %s621_s11  ;;  %s175_s24 = scalar_lea.vmem [#allocation4], %s566_s10 }
  0xcc   : > { %v384_v4 = vadd.f32 %v383_v3, %v369_v2  ;;  %v348_v5 = vadd.f32 %v347_v1, %v325_v52  ;;  %s466_s25 = sshll.u32 %s175_s24, 4  ;;  %s468_s26 = sshll.u32 %s464_s20, 4  ;;  %s467_s25 = int_to_ptr.vmem [resolvable:$true] %s466_s25  ;;  %s469_s26 = int_to_ptr.hbm [resolvable:$true] %s468_s26 }
  0xcd   : > { %s437_s16 = scalar_lea.sflag [#allocation5], %s925_s8  ;;  %s779_s27 = sshra.s32 %s469_s26, 4  ;;  %s780_s27 = int_to_ptr.hbm [resolvable:$true] %s779_s27 }
  0xce   : > { %v349_v8 = vadd.f32 %v348_v5, %v928_v17  ;;  %v385_v9 = vadd.f32 %v384_v4, %v370_v6  ;;  %s781_s28 = scalar_lea.hbm %s780_s27, 2  ;;  %s785_s4 = scalar_lea.hbm %s1017_s3, 8 }
  0xcf   : > { %p782_p4 = scmp.ne.s32.totalorder %s780_s27, %s781_s28  ;;  %p786_p9 = scmp.lt.s32.totalorder %s780_s27, %s1017_s3 }
  0xd0   : > { %v386_v11 = vadd.f32 %v385_v9, %v371_v7  ;;  %v350_v12 = vadd.f32 %v349_v8, %v936_v23  ;;  %p787_p10 = scmp.lt.s32.totalorder %s785_s4, %s781_s28 }
  0xd1   : > { %p783_p7 = pnand %p782_p4, %p893_p5 }
  0xd2   : > { %v351_v13 = vadd.f32 %v350_v12, %v943_v35  ;;  %v387_v15 = vadd.f32 %v386_v11, %v372_v10  ;;  %p788_p11 = por %p787_p10, %p786_p9 }
  0xd3   : > { %p784_p8 = pneg %p783_p7 }
  0xd4   : > { %v388_v16 = vadd.f32 %v387_v15, %v373_v14  ;;  %v352_v18 = vadd.f32 %v351_v13, %v335_v53 }
  0xd5   : > { %p789_p12 = pnand %p788_p11, %p784_p8 }
  0xd6   : > { %v353_v20 = vrot.slane %v352_v18, 4  ;;  %v389_v17 = vadd.f32 %v388_v16, %v374_v19 }
  0xd8   : > { %v354_v21 = vadd.f32 %v353_v20, %v352_v18  ;;  %v390_v22 = vrot.slane %v389_v17, 4 }
  0xda   : > { %v355_v24 = vrot.slane %v354_v21, 2  ;;  %v391_v25 = vadd.f32 %v390_v22, %v389_v17 }
  0xdc   : > { %v356_v26 = vadd.f32 %v355_v24, %v354_v21  ;;  %v392_v23 = vrot.slane %v391_v25, 2 }
  0xde   : > { %v357_v27 = vrot.slane %v356_v26, 1  ;;  %v393_v28 = vadd.f32 %v392_v23, %v391_v25 }
  0xe0   : > { %v394_v29 = vrot.slane %v393_v28, 1  ;;  %v358_v30 = vadd.f32 %v357_v27, %v356_v26 }
  0xe2   : > { %v395_v31 = vadd.f32 %v394_v29, %v393_v28 }
  0xe4   : > { %v397_v32 = vsel %vm396_vm2, %v358_v30, %v395_v31 }
  0xe5   : > { %398 = vst [vmem:[%s175_s24] sm:$0x3] %v397_v32 }
  0xe6   : > { %792 = shalt.err (!%p789_p12)
}
  0xe7   : > { %692 = dma.vmem_to_hbm [thread:$0]  (%p893_p5), %s467_s25, 32, %s469_s26, %s437_s16  }
  0xe8 PF: > { %p702_p13 = scmp.ge.s32.totalorder %s831_s15, 2  ;;  %s480_s8 = sand.u32 1, %s819_s12  }
  0xe9   : > { %s481_s7 = scalar_lea.sflag [#allocation3], %s480_s8 }
  0xea   : > { %p696_p0 = pnand %p702_p13, %p897_p6 }
  0xec   : > { %p697_p1 = pneg %p696_p0 }
  0xee   : > { %810 = dma.done.wait (%p697_p1), %s481_s7, 1024  }
  0xef   : > { %812 = vsyncadd (%p697_p1), %s481_s7, 4294966272  ;;  %s491_s9 = scalar_lea.sflag [#allocation5], %s480_s8 }
  0xf0   : > { %814 = dma.done.wait (%p697_p1), %s491_s9, 32  }
  0xf1   : > { %816 = vsyncadd (%p697_p1), %s491_s9, 4294967264  ;;  %p17_p5 = scmp.ge.s32.totalorder %s880_s18, 6   ;;  %s1020_s12 = smov %s823_s13 }
  0xf2   : > { %s1021_s13 = smov %s827_s14  ;;  %s1022_s14 = smov %s891_s21 }
  0xf3   : > { %s1023_s15 = smov %s880_s18  ;;  %19 = sbr.rel (!%p17_p5) target bundleno = 5 (0x5), region = 80 }
  0xf8   :  { %497 = vsyncpa [#allocation3], 1 }
  0xf9   :  { %499 = vsyncpa [#allocation3 + $0x1], 1 }
  0xfa   :  { %500 = vsyncpa [#allocation5], 1 }
  0xfb   :  { %502 = vsyncpa [#allocation5 + $0x1], 1 }

</bundles_post_ra>
